<compile_context>
chip_gen: v7x
topology: tpu7x:2x2x1
jax: 0.10.0
libtpu: 0.0.40
codegen_flags: <defaults>
</compile_context>

<pallas_src>
import jax
import jax.numpy as jnp
from jax.experimental import pallas as pl
from jax.experimental.pallas import tpu as pltpu


# ----------------------------------------------------------------------------- utilities
def _round_up(x, m):
    return ((x + m - 1) // m) * m


def _default_split_layer2():
    """True on 128x128-MXU generations (<= v5); False on 256x256-MXU parts (v6e/v7x)."""
    try:
        kind = jax.devices()[0].device_kind.lower()
    except Exception:
        return False
    return not any(tag in kind for tag in ("v6", "v7", "tpu7", "7x"))


def _choose_tiling(B, block_b):
    """Pick (TB, n_tiles).  n_tiles*TB >= B; last tile may be ragged (reads masked)."""
    if B < 256:
        # One tile covering the whole batch: block == full array, so no (8,128) constraint
        # and no padding / ragged edge at all.
        return B, 1
    block_b = max(256, _round_up(block_b, 128))
    n_tiles = max(2, pl.cdiv(B, block_b))       # >= 2 tiles so both v7x TCs get work
    if n_tiles % 2:
        n_tiles += 1                            # even tile count -> no straggler core
    TB = _round_up(pl.cdiv(B, n_tiles), 128)    # lane-dense (2, TB) output blocks
    n_tiles = pl.cdiv(B, TB)                    # never creates a fully-empty tile
    return TB, n_tiles


# ----------------------------------------------------------------------------- kernel
def _make_twin_critic_kernel(split_layer2):
    def kernel(x_ref, w1_ref, b1_ref, w2_ref, b2_ref, w3t_ref, b3t_ref, q_ref):
        # Layer 1 (both nets fused): (TB, D) @ (D, 2H); bf16 operands, f32 accumulation.
        x = x_ref[...].astype(jnp.bfloat16)
        h = jnp.dot(x, w1_ref[...], preferred_element_type=jnp.float32) + b1_ref[...]
        h = jnp.maximum(h, 0.0).astype(jnp.bfloat16)

        H2 = w2_ref.shape[0]
        H = H2 // 2
        dn = (((1,), (1,)), ((), ()))  # contract last dims: W3T @ h^T -> (2, TB)

        if split_layer2:
            # 128x128 MXU (<= v5): two dense 128-wide matmuls instead of one half-zero
            # 256-wide block-diagonal matmul.
            h1 = jnp.dot(h[:, :H], w2_ref[:H, :H],
                         preferred_element_type=jnp.float32) + b2_ref[:, :H]
            h2 = jnp.dot(h[:, H:], w2_ref[H:, H:],
                         preferred_element_type=jnp.float32) + b2_ref[:, H:]
            h1 = jnp.maximum(h1, 0.0)
            h2 = jnp.maximum(h2, 0.0)
            # Layer 3 in f32, directly in lane-dense (2, TB) orientation.
            q1 = jax.lax.dot_general(w3t_ref[:, :H], h1, dn,
                                     preferred_element_type=jnp.float32)
            q2 = jax.lax.dot_general(w3t_ref[:, H:], h2, dn,
                                     preferred_element_type=jnp.float32)
            qT = q1 + q2 + b3t_ref[...]
        else:
            # 256x256 MXU (v6e/v7x): one fused block-diagonal matmul.
            h = jnp.dot(h, w2_ref[...], preferred_element_type=jnp.float32) + b2_ref[...]
            h = jnp.maximum(h, 0.0)
            # Layer 3 in f32 (negligible cost): qT = W3T @ h^T, no transpose materialized.
            qT = jax.lax.dot_general(w3t_ref[...], h, dn,
                                     preferred_element_type=jnp.float32) + b3t_ref[...]

        q_ref[...] = qT.astype(q_ref.dtype)

    return kernel


# ----------------------------------------------------------------------------- packing (one-time)
def pack_twin_critic_params(params):
    """Fuse the two nets' weights once; reuse the result across all forward calls."""
    wdt = jnp.bfloat16
    H = params["w12"].shape[0]
    H2 = 2 * H
    W1 = jnp.concatenate([params["w11"], params["w21"]], axis=1).astype(wdt)      # (D, 2H)
    b1 = jnp.concatenate([params["b11"], params["b21"]], axis=1)                   # (1, 2H) f32
    W2 = (jnp.zeros((H2, H2), jnp.float32)
          .at[:H, :H].set(params["w12"])
          .at[H:, H:].set(params["w22"])).astype(wdt)                              # (2H, 2H) bf16
    b2 = jnp.concatenate([params["b12"], params["b22"]], axis=1)                   # (1, 2H) f32
    W3T = (jnp.zeros((2, H2), jnp.float32)
           .at[0, :H].set(params["w13"][:, 0])
           .at[1, H:].set(params["w23"][:, 0]))                                    # (2, 2H) f32
    b3T = jnp.concatenate([params["b13"], params["b23"]], axis=0)                  # (2, 1) f32
    return {"W1": W1, "b1": b1, "W2": W2, "b2": b2, "W3T": W3T, "b3T": b3T}


# ----------------------------------------------------------------------------- forward
def twin_critic_forward(x, packed, *, block_b=2048, split_layer2=None):
    """x: (B, D) f32.  packed: output of pack_twin_critic_params.  Returns (q1, q2), each (B, 1)."""
    B, D = x.shape
    H2 = packed["W1"].shape[1]
    if split_layer2 is None:
        split_layer2 = _default_split_layer2()

    TB, n_tiles = _choose_tiling(B, block_b)
    B_out = TB * n_tiles

    weight_args = (packed["W1"], packed["b1"], packed["W2"], packed["b2"],
                   packed["W3T"], packed["b3T"])

    def _full_spec(a):
        ndim = len(a.shape)
        return pl.BlockSpec(tuple(int(s) for s in a.shape), lambda i, _n=ndim: (0,) * _n)

    # VMEM working-set estimate (x tiles double-buffered + resident weights + activations).
    weight_bytes = sum(int(a.size) * a.dtype.itemsize for a in weight_args)
    working = (2 * TB * D * x.dtype.itemsize        # x tiles (double-buffered)
               + 2 * 2 * TB * 4                     # (2, TB) f32 output tiles
               + 2 * weight_bytes                   # resident weights/biases (+ slack)
               + 8 * TB * H2 * 4)                   # hidden activations / temporaries
    vmem_limit = int(min(max(2 * working, 16 * 1024 * 1024), 64 * 1024 * 1024))

    H = H2 // 2
    flops = 2 * B_out * (D * H2 + 2 * H * H + 2 * H)
    bytes_accessed = B * D * x.dtype.itemsize + weight_bytes + 2 * B_out * 4

    q = pl.pallas_call(
        _make_twin_critic_kernel(split_layer2),
        out_shape=jax.ShapeDtypeStruct((2, B_out), jnp.float32),
        grid=(n_tiles,),
        in_specs=[pl.BlockSpec((TB, D), lambda i: (i, 0))]        # pipelined batch tiles
                 + [_full_spec(a) for a in weight_args],           # weights resident in VMEM
        out_specs=pl.BlockSpec((2, TB), lambda i: (0, i)),         # lane-dense output slab
        compiler_params=pltpu.CompilerParams(
            dimension_semantics=("parallel",),                     # shard batch tiles across TCs
            vmem_limit_bytes=vmem_limit,
        ),
        cost_estimate=pl.CostEstimate(
            flops=flops, transcendentals=0, bytes_accessed=bytes_accessed),
    )(x, *weight_args)

    q1 = q[0, :B][:, None]
    q2 = q[1, :B][:, None]
    return q1, q2


# ----------------------------------------------------------------------------- init + reference
def _xavier_normal(key, fan_in, fan_out):
    # Matches torch.nn.init.xavier_normal_: std = sqrt(2 / (fan_in + fan_out))
    std = (2.0 / (fan_in + fan_out)) ** 0.5
    return std * jax.random.normal(key, (fan_in, fan_out), dtype=jnp.float32)


def init_twin_critic(key, input_size, hidden_size=128):
    keys = jax.random.split(key, 6)
    return {
        # net1
        "w11": _xavier_normal(keys[0], input_size, hidden_size),
        "b11": jnp.full((1, hidden_size), 0.1, dtype=jnp.float32),
        "w12": _xavier_normal(keys[1], hidden_size, hidden_size),
        "b12": jnp.full((1, hidden_size), 0.1, dtype=jnp.float32),
        "w13": _xavier_normal(keys[2], hidden_size, 1),
        "b13": jnp.full((1, 1), 0.1, dtype=jnp.float32),
        # net2
        "w21": _xavier_normal(keys[3], input_size, hidden_size),
        "b21": jnp.full((1, hidden_size), 0.1, dtype=jnp.float32),
        "w22": _xavier_normal(keys[4], hidden_size, hidden_size),
        "b22": jnp.full((1, hidden_size), 0.1, dtype=jnp.float32),
        "w23": _xavier_normal(keys[5], hidden_size, 1),
        "b23": jnp.full((1, 1), 0.1, dtype=jnp.float32),
    }


def _reference_forward(x, p):
    def mlp(x, w1, b1, w2, b2, w3, b3):
        h = jnp.maximum(x @ w1 + b1, 0.0)
        h = jnp.maximum(h @ w2 + b2, 0.0)
        return h @ w3 + b3
    q1 = mlp(x, p["w11"], p["b11"], p["w12"], p["b12"], p["w13"], p["b13"])
    q2 = mlp(x, p["w21"], p["b21"], p["w22"], p["b22"], p["w23"], p["b23"])
    return q1, q2


if __name__ == "__main__":
    key = jax.random.PRNGKey(0)
    k_params, k_x = jax.random.split(key)

    # Small demo shapes; batch=20 exercises a non-multiple-of-8 single-tile path.
    batch, input_size, hidden_size = 20, 16, 32
    params = init_twin_critic(k_params, input_size, hidden_size)
    x = jax.random.normal(k_x, (batch, input_size), dtype=jnp.float32)

    # One-time packing, hoisted out of the forward path; forward itself is jitted.
    packed = pack_twin_critic_params(params)
    fwd = jax.jit(twin_critic_forward)

    q1, q2 = fwd(x, packed)
    q1 = jax.block_until_ready(q1)
    q2 = jax.block_until_ready(q2)

    # Sanity check against pure-JAX f32 reference (tolerance accounts for bf16 layers 1-2).
    r1, r2 = _reference_forward(x, params)
    assert q1.shape == (batch, 1) and q2.shape == (batch, 1)
    assert jnp.allclose(q1, r1, atol=5e-2, rtol=5e-2), float(jnp.max(jnp.abs(q1 - r1)))
    assert jnp.allclose(q2, r2, atol=5e-2, rtol=5e-2), float(jnp.max(jnp.abs(q2 - r2)))

    print("KERNEL_OK")
</pallas_src>

<mosaic_0001>
module attributes {stable_mosaic.version = 11 : i64} {
  func.func @kernel(%arg0: i32, %arg1: memref<20x16xf32, #tpu.memory_space<vmem>>, %arg2: memref<16x64xbf16, #tpu.memory_space<vmem>>, %arg3: memref<1x64xf32, #tpu.memory_space<vmem>>, %arg4: memref<64x64xbf16, #tpu.memory_space<vmem>>, %arg5: memref<1x64xf32, #tpu.memory_space<vmem>>, %arg6: memref<2x64xf32, #tpu.memory_space<vmem>>, %arg7: memref<2x1xf32, #tpu.memory_space<vmem>>, %arg8: memref<2x20xf32, #tpu.memory_space<vmem>>) attributes {dimension_semantics = [#tpu.dimension_semantics<parallel>], iteration_bounds = array<i64: 1>, scalar_prefetch = 0 : i64, scratch_operands = 0 : i64, tpu.core_type = #tpu.core_type<tc>, window_params = [{transform_indices = @transform_0, window_bounds = array<i64: 20, 16>}, {pipeline_mode = #tpu.pipeline_mode<synchronous>, transform_indices = @transform_1, window_bounds = array<i64: 16, 64>}, {pipeline_mode = #tpu.pipeline_mode<synchronous>, transform_indices = @transform_2, window_bounds = array<i64: 1, 64>}, {pipeline_mode = #tpu.pipeline_mode<synchronous>, transform_indices = @transform_3, window_bounds = array<i64: 64, 64>}, {pipeline_mode = #tpu.pipeline_mode<synchronous>, transform_indices = @transform_4, window_bounds = array<i64: 1, 64>}, {pipeline_mode = #tpu.pipeline_mode<synchronous>, transform_indices = @transform_5, window_bounds = array<i64: 2, 64>}, {pipeline_mode = #tpu.pipeline_mode<synchronous>, transform_indices = @transform_6, window_bounds = array<i64: 2, 1>}, {transform_indices = @transform_7, window_bounds = array<i64: 2, 20>}]} {
    %c0 = arith.constant 0 : index
    %c0_0 = arith.constant 0 : index
    %0 = vector.load %arg1[%c0, %c0_0] : memref<20x16xf32, #tpu.memory_space<vmem>>, vector<20x16xf32>
    %1 = arith.truncf %0 : vector<20x16xf32> to vector<20x16xbf16>
    %c0_1 = arith.constant 0 : index
    %c0_2 = arith.constant 0 : index
    %2 = vector.load %arg2[%c0_1, %c0_2] : memref<16x64xbf16, #tpu.memory_space<vmem>>, vector<16x64xbf16>
    %cst = arith.constant dense<0.000000e+00> : vector<20x64xf32>
    %3 = tpu.matmul %1, %2, %cst {dimension_numbers = #tpu.dot_dimension_numbers<[1], [0], [0], [1], [0, 0, 1, 1], [], []>} : vector<20x16xbf16>, vector<16x64xbf16>, vector<20x64xf32> -> vector<20x64xf32>
    %c0_3 = arith.constant 0 : index
    %c0_4 = arith.constant 0 : index
    %4 = vector.load %arg3[%c0_3, %c0_4] : memref<1x64xf32, #tpu.memory_space<vmem>>, vector<1x64xf32>
    %5 = vector.broadcast %4 : vector<1x64xf32> to vector<20x64xf32>
    %6 = arith.addf %3, %5 : vector<20x64xf32>
    %cst_5 = arith.constant 0.000000e+00 : f32
    %7 = vector.broadcast %cst_5 : f32 to vector<20x64xf32>
    %8 = arith.maximumf %6, %7 : vector<20x64xf32>
    %9 = arith.truncf %8 : vector<20x64xf32> to vector<20x64xbf16>
    %10 = vector.extract_strided_slice %9 {offsets = [0, 0], sizes = [20, 32], strides = [1, 1]} : vector<20x64xbf16> to vector<20x32xbf16>
    %c0_6 = arith.constant 0 : index
    %c0_7 = arith.constant 0 : index
    %11 = vector.load %arg4[%c0_6, %c0_7] : memref<64x64xbf16, #tpu.memory_space<vmem>>, vector<32x32xbf16>
    %cst_8 = arith.constant dense<0.000000e+00> : vector<20x32xf32>
    %12 = tpu.matmul %10, %11, %cst_8 {dimension_numbers = #tpu.dot_dimension_numbers<[1], [0], [0], [1], [0, 0, 1, 1], [], []>} : vector<20x32xbf16>, vector<32x32xbf16>, vector<20x32xf32> -> vector<20x32xf32>
    %c0_9 = arith.constant 0 : index
    %c0_10 = arith.constant 0 : index
    %13 = vector.load %arg5[%c0_9, %c0_10] : memref<1x64xf32, #tpu.memory_space<vmem>>, vector<1x32xf32>
    %14 = vector.broadcast %13 : vector<1x32xf32> to vector<20x32xf32>
    %15 = arith.addf %12, %14 : vector<20x32xf32>
    %16 = vector.extract_strided_slice %9 {offsets = [0, 32], sizes = [20, 32], strides = [1, 1]} : vector<20x64xbf16> to vector<20x32xbf16>
    %c32 = arith.constant 32 : index
    %c32_11 = arith.constant 32 : index
    %17 = vector.load %arg4[%c32, %c32_11] : memref<64x64xbf16, #tpu.memory_space<vmem>>, vector<32x32xbf16>
    %cst_12 = arith.constant dense<0.000000e+00> : vector<20x32xf32>
    %18 = tpu.matmul %16, %17, %cst_12 {dimension_numbers = #tpu.dot_dimension_numbers<[1], [0], [0], [1], [0, 0, 1, 1], [], []>} : vector<20x32xbf16>, vector<32x32xbf16>, vector<20x32xf32> -> vector<20x32xf32>
    %c0_13 = arith.constant 0 : index
    %c32_14 = arith.constant 32 : index
    %19 = vector.load %arg5[%c0_13, %c32_14] : memref<1x64xf32, #tpu.memory_space<vmem>>, vector<1x32xf32>
    %20 = vector.broadcast %19 : vector<1x32xf32> to vector<20x32xf32>
    %21 = arith.addf %18, %20 : vector<20x32xf32>
    %cst_15 = arith.constant 0.000000e+00 : f32
    %22 = vector.broadcast %cst_15 : f32 to vector<20x32xf32>
    %23 = arith.maximumf %15, %22 : vector<20x32xf32>
    %cst_16 = arith.constant 0.000000e+00 : f32
    %24 = vector.broadcast %cst_16 : f32 to vector<20x32xf32>
    %25 = arith.maximumf %21, %24 : vector<20x32xf32>
    %c0_17 = arith.constant 0 : index
    %c0_18 = arith.constant 0 : index
    %26 = vector.load %arg6[%c0_17, %c0_18] : memref<2x64xf32, #tpu.memory_space<vmem>>, vector<2x32xf32>
    %cst_19 = arith.constant dense<0.000000e+00> : vector<2x20xf32>
    %27 = tpu.matmul %26, %23, %cst_19 {dimension_numbers = #tpu.dot_dimension_numbers<[1], [1], [0], [0], [0, 0, 1, 0], [], []>} : vector<2x32xf32>, vector<20x32xf32>, vector<2x20xf32> -> vector<2x20xf32>
    %c0_20 = arith.constant 0 : index
    %c32_21 = arith.constant 32 : index
    %28 = vector.load %arg6[%c0_20, %c32_21] : memref<2x64xf32, #tpu.memory_space<vmem>>, vector<2x32xf32>
    %cst_22 = arith.constant dense<0.000000e+00> : vector<2x20xf32>
    %29 = tpu.matmul %28, %25, %cst_22 {dimension_numbers = #tpu.dot_dimension_numbers<[1], [1], [0], [0], [0, 0, 1, 0], [], []>} : vector<2x32xf32>, vector<20x32xf32>, vector<2x20xf32> -> vector<2x20xf32>
    %30 = arith.addf %27, %29 : vector<2x20xf32>
    %c0_23 = arith.constant 0 : index
    %c0_24 = arith.constant 0 : index
    %31 = vector.load %arg7[%c0_23, %c0_24] : memref<2x1xf32, #tpu.memory_space<vmem>>, vector<2x1xf32>
    %32 = vector.broadcast %31 : vector<2x1xf32> to vector<2x20xf32>
    %33 = arith.addf %30, %32 : vector<2x20xf32>
    %c0_25 = arith.constant 0 : index
    %c0_26 = arith.constant 0 : index
    %34 = vector.load %arg8[%c0_25, %c0_26] : memref<2x20xf32, #tpu.memory_space<vmem>>, vector<2x20xf32>
    tpu.vector_store %arg8[%c0_25, %c0_26], %33 {strides = array<i32>} : memref<2x20xf32, #tpu.memory_space<vmem>>, vector<2x20xf32>,
    return
  }
  func.func @transform_0(%arg0: i32) -> (i32, i32) {
    %c0_i32 = arith.constant 0 : i32
    %c0_i32_0 = arith.constant 0 : i32
    return %arg0, %c0_i32 : i32, i32
  }
  func.func @transform_1(%arg0: i32) -> (i32, i32) {
    %c0_i32 = arith.constant 0 : i32
    %c0_i32_0 = arith.constant 0 : i32
    %c0_i32_1 = arith.constant 0 : i32
    return %c0_i32, %c0_i32_0 : i32, i32
  }
  func.func @transform_2(%arg0: i32) -> (i32, i32) {
    %c0_i32 = arith.constant 0 : i32
    %c0_i32_0 = arith.constant 0 : i32
    %c0_i32_1 = arith.constant 0 : i32
    return %c0_i32, %c0_i32_0 : i32, i32
  }
  func.func @transform_3(%arg0: i32) -> (i32, i32) {
    %c0_i32 = arith.constant 0 : i32
    %c0_i32_0 = arith.constant 0 : i32
    %c0_i32_1 = arith.constant 0 : i32
    return %c0_i32, %c0_i32_0 : i32, i32
  }
  func.func @transform_4(%arg0: i32) -> (i32, i32) {
    %c0_i32 = arith.constant 0 : i32
    %c0_i32_0 = arith.constant 0 : i32
    %c0_i32_1 = arith.constant 0 : i32
    return %c0_i32, %c0_i32_0 : i32, i32
  }
  func.func @transform_5(%arg0: i32) -> (i32, i32) {
    %c0_i32 = arith.constant 0 : i32
    %c0_i32_0 = arith.constant 0 : i32
    %c0_i32_1 = arith.constant 0 : i32
    return %c0_i32, %c0_i32_0 : i32, i32
  }
  func.func @transform_6(%arg0: i32) -> (i32, i32) {
    %c0_i32 = arith.constant 0 : i32
    %c0_i32_0 = arith.constant 0 : i32
    %c0_i32_1 = arith.constant 0 : i32
    return %c0_i32, %c0_i32_0 : i32, i32
  }
  func.func @transform_7(%arg0: i32) -> (i32, i32) {
    %c0_i32 = arith.constant 0 : i32
    %c0_i32_0 = arith.constant 0 : i32
    return %c0_i32, %arg0 : i32, i32
  }
}

</mosaic_0001>

<bundles_post_ra>
// kernel: twin_critic_forward.1
= control target key start
LH: loop header
LB: loop body
LE: loop exit
PB: predicated region body
PF: predicated region fallthrough
CT: control target
= control target key end

     0   :  { %vm47_vm0 = vcmask 130048   ;;  %s552_s12 = smov 96   ;;  %vm130_vm1 = vcmask 261120   ;;  %v553_v26 = vmov 0.0|0.0   ;;  %vm554_vm3 = vmmov 0   ;;  %s660_s1 = inlined_call_operand.vmem [shape: bf16[16,64], index: 1, kind: input, shape index: {}]   ;;  %s661_s0 = inlined_call_operand.vmem [shape: f32[20,16], index: 0, kind: input, shape index: {}]   ;;  %s662_s3 = inlined_call_operand.vmem [shape: bf16[64,64], index: 3, kind: input, shape index: {}]   ;;  %s663_s2 = inlined_call_operand.vmem [shape: f32[1,64], index: 2, kind: input, shape index: {}]   ;;  %s664_s4 = inlined_call_operand.vmem [shape: f32[1,64], index: 4, kind: input, shape index: {}]   ;;  %s665_s5 = inlined_call_operand.vmem [shape: f32[2,64], index: 5, kind: input, shape index: {}]   ;;  %s666_s6 = inlined_call_operand.vmem [shape: f32[2,1], index: 6, kind: input, shape index: {}]   ;;  %s667_s7 = inlined_call_operand.vmem [shape: f32[2,20], index: 7, kind: output, shape index: {}]  }
   0x1   :  { %v547_v0 = vld [vmem:[%s660_s1] sm:$0xff]   ;;  %v28_v2 = vld [vmem:[%s661_s0 + $0x8] sm:$0xff]  ;;  %v29_v3 = vld [vmem:[%s661_s0 + $0x10] sm:$0xf]  ;;  %v555_v40 = vmov 0.0   ;;  %v556_v42 = vmov 0  }
   0x2   :  { %v27_v1 = vld [vmem:[%s661_s0] sm:$0xff]  ;;  %493 = vmatprep.subr.bf16.mxu0 %v547_v0  ;;  %v31_v5 = vpack.c.bf16 %v29_v3, %v29_v3  ;;  %v549_v7 = vld [vmem:[%s662_s3 + $0x10] sm:$0xff]   ;;  %v550_v8 = vld [vmem:[%s662_s3 + $0x8] sm:$0xff]   ;;  %546 = vset.pattern.permute.xlu0 %v556_v42  ;;  %vm447_vm4 = vcmask 156672  }
   0x3   :  { %v30_v4 = vpack.c.bf16 %v28_v2, %v27_v1  ;;  %494 = vmatpush3.bf16.msra.mxu0 %v547_v0  ;;  %v548_v6 = vld [vmem:[%s662_s3] sm:$0xff]   ;;  %205 = vrot.lane.b32.xlu0 %v549_v7, %s552_s12  ;;  %v551_v9 = vld [vmem:[%s662_s3 + $0x18] sm:$0xff]   ;;  %vm642_vm2 = vmpackc.low %vm130_vm1, %vm130_vm1 }
   0x4   :  { %499 = vmatprep.subr.bf16.mxu1 %v548_v6  ;;  %v453_v12 = vld [vmem:[%s663_s2] ss:$0 sm:$0xff] }
   0x5   :  { %495 = vmatprep.mubr.msk.bf16.mxu0 %vm47_vm0, %v30_v4  ;;  %500 = vmatpush3.bf16.msra.mxu1 %v548_v6  ;;  %v457_v25 = vld [vmem:[%s664_s4] ss:$0 sm:$0xff] }
   0x6   :  { %496 = vmatmul.mubr.msk.bf16.vlgmr.msra.gmra.mrb[0].mxu0 %vm47_vm0, %v31_v5  ;;  %501 = vmatprep.subr.bf16.mxu1 %v550_v8  ;;  %v274_v27 = vld [vmem:[%s665_s5] sm:$0x3] }
   0x7   :  { %207 = vrot.lane.b32.xlu0 %v551_v9, %s552_s12  ;;  %v440_v43 = vld [vmem:[%s666_s6] sm:$0x3] }
   0x9   :  { %502 = vmatpush3.bf16.msra.mxu1 %v550_v8 }
   0xa   :  { %533 = vmatprep.subr.bf16.mxu1 %v553_v26 }
   0xb   :  { %211 = vrot.lane.b32.xlu0 %v457_v25, %s552_s12 }
   0xf   :  { %443 = vperm.xlu0 %546, %v440_v43  }
  0x75   :  { %v206_v10 = vpop.permute.xlu0 %205 }
  0x76   :  { %507 = vmatprep.subr.bf16.mxu0 %v206_v10 }
  0x77   :  { %508 = vmatpush3.bf16.msra.mxu0 %v206_v10 }
  0x79   :  { %v208_v11 = vpop.permute.xlu0 %207 }
  0x7a   :  { %509 = vmatprep.subr.bf16.mxu0 %v208_v11 }
  0x7b   :  { %510 = vmatpush3.bf16.msra.mxu0 %v208_v11 }
  0x7c   :  { %537 = vmatprep.subr.bf16.mxu0 %v553_v26 }
  0x7d   :  { %v212_v45 = vpop.permute.xlu0 %211 }
  0x8e   :  { %v444_v61 = vpop.permute.xlu0 %443 }
  0xd9   :  { %v497_v13 = vpop.f32.mrb[0].mxu0 }
  0xda   :  { %v97_v14 = vadd.f32 %v497_v13, %v453_v12  ;;  %v88_v15 = vpop.f32.mrb[1].mxu0 }
  0xdb   :  { %v89_v16 = vadd.f32 %v453_v12, %v88_v15  ;;  %v498_v17 = vpop.f32.mrb[2].mxu0 }
  0xdc   :  { %v91_v18 = vpop.f32.mrb[3].mxu0  ;;  %v104_v20 = vmax.f32 %v97_v14, 0.0 }
  0xdd   :  { %v92_v19 = vadd.f32 %v453_v12, %v91_v18  ;;  %v102_v21 = vmax.f32 %v89_v16, 0.0 }
  0xde   :  { %v106_v24 = vpack.c.bf16 %v104_v20, %v104_v20 }
  0xdf   :  { %v103_v22 = vmax.f32 %v92_v19, 0.0 }
  0xe1   :  { %v105_v23 = vpack.c.bf16 %v103_v22, %v102_v21 }
  0xe3   :  { %191 = vrot.lane.b32.xlu1 %v105_v23, %s552_s12  ;;  %503 = vmatprep.mubr.msk.bf16.mxu1 %vm130_vm1, %v105_v23 }
  0xe4   :  { %504 = vmatmul.mubr.msk.bf16.vlgmr.msra.gmra.mrb[0].mxu1 %vm130_vm1, %v106_v24 }
  0xe5   :  { %521 = vmatprep.mubr.msk.f32.mxu1 %vm554_vm3, %v555_v40 }
  0xe7   :  { %193 = vrot.lane.b32.xlu1 %v106_v24, %s552_s12 }
  0xeb   :  { %276 = vrot.lane.b32.xlu1 %v274_v27, %s552_s12 }
 0x155   :  { %v192_v28 = vpop.permute.xlu1 %191 }
 0x156   :  { %511 = vmatprep.mubr.msk.bf16.mxu0 %vm130_vm1, %v192_v28 }
 0x159   :  { %v194_v29 = vpop.permute.xlu1 %193 }
 0x15a   :  { %512 = vmatmul.mubr.msk.bf16.vlgmr.msra.gmra.mrb[4].mxu0 %vm130_vm1, %v194_v29 }
 0x15b   :  { %530 = vmatprep.mubr.msk.f32.mxu0 %vm554_vm3, %v555_v40 }
 0x15d   :  { %v277_v57 = vpop.permute.xlu1 %276 }
 0x1b7   :  { %v505_v30 = vpop.f32.mrb[0].mxu1 }
 0x1b8   :  { %v171_v31 = vpop.f32.mrb[1].mxu1  ;;  %v180_v41 = vadd.f32 %v505_v30, %v457_v25 }
 0x1b9   :  { %v172_v32 = vadd.f32 %v457_v25, %v171_v31  ;;  %v506_v33 = vpop.f32.mrb[2].mxu1 }
 0x1ba   :  { %v174_v34 = vpop.f32.mrb[3].mxu1  ;;  %v270_v44 = vmax.f32 %v180_v41, 0.0 }
 0x1bb   :  { %v175_v35 = vadd.f32 %v457_v25, %v174_v34  ;;  %v268_v36 = vmax.f32 %v172_v32, 0.0 }
 0x1bd   :  { %v269_v37 = vmax.f32 %v175_v35, 0.0 }
 0x1bf   :  { %v538_v39 = vpack.c.bf16 %v269_v37, %v268_v36 }
 0x1c1   :  { %540 = vmatpush3.bf16.xpose.msk.msra.mxu0 %vm642_vm2, %v538_v39 }
 0x1c2   :  { %528 = vmatprep.subr.mxu0 %v555_v40 }
 0x1c9   :  { %529 = vmatpush3.xpose.msk.msra.mxu0 %vm130_vm1, %v270_v44 }
 0x1cc   :  { %531 = vmatmul.mubr.msk.f32.vlgmr.msra.gmra.mrb[8].mxu0 %vm130_vm1, %v274_v27 }
 0x22d   :  { %v513_v46 = vpop.f32.mrb[4].mxu0 }
 0x22e   :  { %v254_v47 = vpop.f32.mrb[5].mxu0  ;;  %v263_v55 = vadd.f32 %v513_v46, %v212_v45 }
 0x22f   :  { %v255_v48 = vadd.f32 %v254_v47, %v212_v45  ;;  %v514_v49 = vpop.f32.mrb[6].mxu0 }
 0x230   :  { %v257_v50 = vpop.f32.mrb[7].mxu0  ;;  %v273_v56 = vmax.f32 %v263_v55, 0.0 }
 0x231   :  { %v258_v51 = vadd.f32 %v257_v50, %v212_v45  ;;  %v271_v52 = vmax.f32 %v255_v48, 0.0 }
 0x233   :  { %v272_v53 = vmax.f32 %v258_v51, 0.0 }
 0x235   :  { %v534_v54 = vpack.c.bf16 %v272_v53, %v271_v52 }
 0x237   :  { %536 = vmatpush3.bf16.xpose.msk.msra.mxu1 %vm642_vm2, %v534_v54 }
 0x238   :  { %519 = vmatprep.subr.mxu1 %v555_v40 }
 0x23f   :  { %520 = vmatpush3.xpose.msk.msra.mxu1 %vm130_vm1, %v273_v56 }
 0x242   :  { %522 = vmatmul.mubr.msk.f32.vlgmr.msra.gmra.mrb[4].mxu1 %vm130_vm1, %v277_v57 }
 0x29f   :  { %v436_v58 = vpop.f32.mrb[8].mxu0 }
 0x2a0   :  { %v532_v59 = vpop.f32.mrb[9].mxu0 }
 0x315   :  { %v355_v60 = vpop.f32.mrb[4].mxu1 }
 0x316   :  { %v437_v62 = vadd.f32 %v436_v58, %v355_v60  ;;  %v523_v63 = vpop.f32.mrb[5].mxu1 }
 0x318   :  { %v446_v0 = vadd.f32 %v444_v61, %v437_v62 }
 0x31a   :  { %448 = vst.msk [vmem:[%s667_s7] sm:$0x3] %vm447_vm4, %v446_v0 }

</bundles_post_ra>
